<compile_context>
chip_gen: v7x
topology: tpu7x:2x2x1
jax: 0.10.0
libtpu: 0.0.40
codegen_flags: <defaults>
</compile_context>

<pallas_src>
import functools

import jax
import jax.numpy as jnp
from jax.experimental import pallas as pl
from jax.experimental.pallas import tpu as pltpu

_LANE = 128
_MIB = 1024 * 1024


def _simam_kernel(x_ref, o_ref, *, cols_true, inv_hw, inv_n, e_lambda, masked):
    # x_ref: (block_rows, cols_padded) tile in VMEM, native dtype.
    x = x_ref[...].astype(jnp.float32)

    # Spatial mean over the true H*W lanes. Pad lanes (if any) are zero, so the
    # plain lane sum already equals the true sum; scale by 1/(H*W) of the true
    # spatial size. Two-pass (mean first, then centered squares) matches the
    # reference numerically — do not fuse into sum / sum-of-squares.
    mu = jnp.sum(x, axis=-1, keepdims=True) * inv_hw
    d = x - mu

    if masked:
        # Pad lanes would contribute mu^2 each to s; mask them out of the sum.
        lane = jax.lax.broadcasted_iota(jnp.int32, x.shape, 1)
        s = jnp.sum(jnp.where(lane < cols_true, d * d, 0.0),
                    axis=-1, keepdims=True)
    else:
        s = jnp.sum(d * d, axis=-1, keepdims=True)

    # Per-row scalar chain on a (block_rows, 1) vector; exact divide here is
    # negligible relative to the per-element work and keeps full f32 accuracy.
    inv = 1.0 / (4.0 * (s * inv_n + e_lambda))

    # Fused per-element epilogue: y = (x-mu)^2 * inv + 0.5, sigmoid via tanh
    # (one EUP op per element), attention multiply, downcast, store.
    y = d * d * inv + 0.5
    att = 0.5 * jnp.tanh(0.5 * y) + 0.5
    o_ref[...] = (x * att).astype(o_ref.dtype)


def _vmem_params():
    """(vmem_limit_bytes, target_tile_bytes) chosen per TPU generation."""
    cap = 64 * _MIB  # conservative default: v7x per-TensorCore VMEM
    try:
        info = pltpu.get_tpu_info()
        cap = int(getattr(info, "vmem_capacity_bytes", cap))
    except Exception:
        pass
    if cap >= 100 * _MIB:
        # v5e / v6e: 128 MiB physical VMEM -> big tiles, high scoped limit.
        return 96 * _MIB, 6 * _MIB
    # v7x: 64 MiB per TensorCore -> leave headroom below physical.
    return 48 * _MIB, 4 * _MIB


def _pick_block_rows(rows, cols, dtype, target_tile_bytes, vmem_limit_bytes):
    """Row-tile size: ~target_tile_bytes per input tile, aligned to the dtype's
    sublane packing, capped so the grid has >= 2 steps when rows permit, and
    shrunk if the explicit VMEM budget would not fit."""
    itemsize = jnp.dtype(dtype).itemsize
    pack = {1: 32, 2: 16}.get(itemsize, 8)

    br = (target_tile_bytes // max(1, cols * itemsize)) // pack * pack
    br = max(pack, br)

    # Keep >= 2 (ideally >= 4) grid steps so the DMA pipeline overlaps and the
    # "parallel" axis can be sharded across TensorCores on multi-TC chips.
    if rows > pack:
        min_steps = 4 if rows >= 4 * pack else 2
        cap = -(-rows // min_steps)                 # ceil(rows / min_steps)
        cap = max(pack, -(-cap // pack) * pack)     # round up to packing
        br = min(br, cap)

    # Explicit VMEM budget: double-buffered input + output tiles in the native
    # dtype plus ~4 live f32 full-tile temporaries inside the kernel body.
    def budget(b):
        tile = b * cols
        return (2 + 2) * tile * itemsize + 4 * tile * 4

    while br > pack and budget(br) > vmem_limit_bytes:
        br = max(pack, (br // 2) // pack * pack)
    # TODO(synk): for very large spatial maps (H*W >= ~256K) even the minimum
    # 8-row tile can exceed the VMEM budget; that path needs a second
    # "arbitrary" grid axis over columns with running per-row sums.

    if br >= rows:
        # Single full block covering the (second-to-last) dim is always legal,
        # even if rows is not a multiple of the packing factor.
        return rows
    return br


def simam(x, e_lambda=1e-4):
    """SimAM forward. x: (B, C, H, W). Returns same shape/dtype."""
    b, c, h, w = x.shape
    n = h * w - 1
    # NOTE: n == 0 (H*W == 1) divides by zero -> NaN, matching PyTorch.
    inv_n = (1.0 / n) if n > 0 else float("inf")
    inv_hw = 1.0 / (h * w)

    rows = b * c
    cols = h * w
    x2d = x.reshape(rows, cols)          # contiguous NCHW -> free reshape

    # Lane-dense layout: pad the spatial axis to a multiple of 128 so every
    # vld/vst is a full unmasked vreg; pad lanes are masked in-kernel and
    # cropped below.
    cols_padded = -(-cols // _LANE) * _LANE
    masked = cols_padded != cols
    if masked:
        x2d = jnp.pad(x2d, ((0, 0), (0, cols_padded - cols)))

    vmem_limit, target_tile = _vmem_params()
    block_rows = _pick_block_rows(rows, cols_padded, x.dtype,
                                  target_tile, vmem_limit)
    grid = (pl.cdiv(rows, block_rows),)  # last block may be partial (OOB rows
                                         # are read-undefined / write-discarded;
                                         # each row depends only on itself)

    kernel = functools.partial(
        _simam_kernel, cols_true=cols, inv_hw=inv_hw, inv_n=inv_n,
        e_lambda=float(e_lambda), masked=masked)

    out2d = pl.pallas_call(
        kernel,
        out_shape=jax.ShapeDtypeStruct((rows, cols_padded), x.dtype),
        grid_spec=pltpu.PrefetchScalarGridSpec(
            num_scalar_prefetch=0,
            grid=grid,
            in_specs=[pl.BlockSpec((block_rows, cols_padded), lambda i: (i, 0))],
            out_specs=pl.BlockSpec((block_rows, cols_padded), lambda i: (i, 0)),
        ),
        compiler_params=pltpu.CompilerParams(
            dimension_semantics=("parallel",),
            vmem_limit_bytes=vmem_limit,
        ),
    )(x2d)

    if masked:
        out2d = out2d[:, :cols]
    return out2d.reshape(b, c, h, w)


def simam_ref(x, e_lambda=1e-4):
    # Pure-JAX reference matching the PyTorch forward.
    b, c, h, w = x.shape
    n = w * h - 1
    xms = (x - x.mean(axis=(2, 3), keepdims=True)) ** 2
    y = xms / (4 * (xms.sum(axis=(2, 3), keepdims=True) / n + e_lambda)) + 0.5
    return x * jax.nn.sigmoid(y)


def _check(x, e_lambda=1e-4):
    out = jax.block_until_ready(simam(x, e_lambda))
    ref = simam_ref(x, e_lambda)
    assert out.shape == x.shape and out.dtype == x.dtype
    assert jnp.allclose(out, ref, atol=1e-5, rtol=1e-5)
    return out


if __name__ == "__main__":
    key = jax.random.PRNGKey(0)
    k1, k2, k3 = jax.random.split(key, 3)

    # SimAM has no learnable parameters (only the e_lambda hyper-parameter).
    # Primary shape from the module spec.
    _check(jax.random.normal(k1, (2, 4, 16, 16), dtype=jnp.float32))
    # rows = 15: exercises the multi-step grid and the partial final block
    # (OOB read-undefined / write-discard path).
    _check(jax.random.normal(k2, (3, 5, 16, 16), dtype=jnp.float32))
    # H*W = 49: exercises lane padding to 128 + in-kernel masking.
    _check(jax.random.normal(k3, (2, 3, 7, 7), dtype=jnp.float32))

    print("KERNEL_OK")
</pallas_src>

<mosaic_0001>
module attributes {stable_mosaic.version = 11 : i64} {
  func.func @_simam_kernel(%arg0: i32, %arg1: memref<8x256xf32, #tpu.memory_space<vmem>>, %arg2: memref<8x256xf32, #tpu.memory_space<vmem>>) attributes {dimension_semantics = [#tpu.dimension_semantics<parallel>], iteration_bounds = array<i64: 1>, scalar_prefetch = 0 : i64, scratch_operands = 0 : i64, tpu.core_type = #tpu.core_type<tc>, window_params = [{transform_indices = @transform_0, window_bounds = array<i64: 8, 256>}, {transform_indices = @transform_1, window_bounds = array<i64: 8, 256>}]} {
    %c0 = arith.constant 0 : index
    %c0_0 = arith.constant 0 : index
    %0 = vector.load %arg1[%c0, %c0_0] : memref<8x256xf32, #tpu.memory_space<vmem>>, vector<8x256xf32>
    %cst = arith.constant dense<0.000000e+00> : vector<8xf32>
    %1 = vector.multi_reduction <add>, %0, %cst [1] : vector<8x256xf32> to vector<8xf32>
    %2 = vector.shape_cast %1 : vector<8xf32> to vector<8x1xf32>
    %cst_1 = arith.constant 3.906250e-03 : f32
    %3 = vector.broadcast %cst_1 : f32 to vector<8x1xf32>
    %4 = arith.mulf %2, %3 : vector<8x1xf32>
    %5 = vector.broadcast %4 : vector<8x1xf32> to vector<8x256xf32>
    %6 = arith.subf %0, %5 : vector<8x256xf32>
    %7 = arith.mulf %6, %6 : vector<8x256xf32>
    %cst_2 = arith.constant dense<0.000000e+00> : vector<8xf32>
    %8 = vector.multi_reduction <add>, %7, %cst_2 [1] : vector<8x256xf32> to vector<8xf32>
    %9 = vector.shape_cast %8 : vector<8xf32> to vector<8x1xf32>
    %cst_3 = arith.constant 0.00392156886 : f32
    %10 = vector.broadcast %cst_3 : f32 to vector<8x1xf32>
    %11 = arith.mulf %9, %10 : vector<8x1xf32>
    %cst_4 = arith.constant 9.99999974E-5 : f32
    %12 = vector.broadcast %cst_4 : f32 to vector<8x1xf32>
    %13 = arith.addf %11, %12 : vector<8x1xf32>
    %cst_5 = arith.constant 4.000000e+00 : f32
    %14 = vector.broadcast %cst_5 : f32 to vector<8x1xf32>
    %15 = arith.mulf %14, %13 : vector<8x1xf32>
    %cst_6 = arith.constant 1.000000e+00 : f32
    %16 = vector.broadcast %cst_6 : f32 to vector<8x1xf32>
    %17 = arith.divf %16, %15 : vector<8x1xf32>
    %18 = arith.mulf %6, %6 : vector<8x256xf32>
    %19 = vector.broadcast %17 : vector<8x1xf32> to vector<8x256xf32>
    %20 = arith.mulf %18, %19 : vector<8x256xf32>
    %cst_7 = arith.constant 5.000000e-01 : f32
    %21 = vector.broadcast %cst_7 : f32 to vector<8x256xf32>
    %22 = arith.addf %20, %21 : vector<8x256xf32>
    %cst_8 = arith.constant 5.000000e-01 : f32
    %23 = vector.broadcast %cst_8 : f32 to vector<8x256xf32>
    %24 = arith.mulf %23, %22 : vector<8x256xf32>
    %25 = math.tanh %24 : vector<8x256xf32>
    %cst_9 = arith.constant 5.000000e-01 : f32
    %26 = vector.broadcast %cst_9 : f32 to vector<8x256xf32>
    %27 = arith.mulf %26, %25 : vector<8x256xf32>
    %cst_10 = arith.constant 5.000000e-01 : f32
    %28 = vector.broadcast %cst_10 : f32 to vector<8x256xf32>
    %29 = arith.addf %27, %28 : vector<8x256xf32>
    %30 = arith.mulf %0, %29 : vector<8x256xf32>
    %c0_11 = arith.constant 0 : index
    %c0_12 = arith.constant 0 : index
    %31 = vector.load %arg2[%c0_11, %c0_12] : memref<8x256xf32, #tpu.memory_space<vmem>>, vector<8x256xf32>
    tpu.vector_store %arg2[%c0_11, %c0_12], %30 {strides = array<i32>} : memref<8x256xf32, #tpu.memory_space<vmem>>, vector<8x256xf32>,
    return
  }
  func.func @transform_0(%arg0: i32) -> (i32, i32) {
    %c0_i32 = arith.constant 0 : i32
    %c0_i32_0 = arith.constant 0 : i32
    return %arg0, %c0_i32 : i32, i32
  }
  func.func @transform_1(%arg0: i32) -> (i32, i32) {
    %c0_i32 = arith.constant 0 : i32
    %c0_i32_0 = arith.constant 0 : i32
    return %arg0, %c0_i32 : i32, i32
  }
}

</mosaic_0001>

<bundles_post_ra>
// kernel: tpu_custom_call.1
= control target key start
LH: loop header
LB: loop body
LE: loop exit
PB: predicated region body
PF: predicated region fallthrough
CT: control target
= control target key end

     0   :  { %6 = vsyncpa [#allocation3], 0  ;;  %s162_s0 = inlined_call_operand.hbm [shape: f32[8,256], index: 0, kind: input, shape index: {}]   ;;  %s163_s1 = inlined_call_operand.hbm [shape: f32[8,256], index: 1, kind: output, shape index: {}]  }
   0x1   :  { %7 = vsyncpa [#allocation4], 0  ;;  %s126_s6 = smov [#allocation2]   ;;  %s78_s10 = scalar_lea.hbm %s162_s0, 256 }
   0x2   :  { %s14_s7 = sshll.u32 %s126_s6, 4  ;;  %p79_p0 = scmp.ne.s32.totalorder %s162_s0, %s78_s10  ;;  %s15_s7 = int_to_ptr.vmem [resolvable:$true] %s14_s7 }
   0x3   :  { %p82_p1 = scmp.lt.u32.totalorder %s78_s10, %s162_s0 }
   0x5   :  { %p84_p2 = pnand %p82_p1, %p79_p0 }
   0x7   :  { %87 = shalt.err (!%p84_p2)
}
   0x8   :  { %s88_s15 = scalar_lea.vmem %s15_s7, 256  ;;  %p93_p4 = scmp.lt.s32.totalorder %s15_s7, %s15_s7 }
   0x9   :  { %p89_p3 = scmp.ne.s32.totalorder %s15_s7, %s88_s15  ;;  %p94_p5 = scmp.lt.s32.totalorder %s88_s15, %s88_s15 }
   0xb   :  { %p95_p6 = por %p94_p5, %p93_p4 }
   0xd   :  { %p96_p7 = pnand %p95_p6, %p89_p3 }
   0xf   :  { %99 = shalt.err (!%p96_p7)
}
  0x10   :  { %17 = dma.hbm_to_vmem [thread:$0]  %s162_s0, 256, %s15_s7, [#allocation3]  }
  0x11   :  { %122 = dma.done.wait [#allocation3], 256  }
  0x12   :  { %123 = vsyncadd [#allocation3], 4294967040  ;;  %v21_v0 = vld [vmem:[#allocation2] sm:$0xff]  ;;  %v22_v1 = vld [vmem:[#allocation2 + $0x8] sm:$0xff]  ;;  %s127_s0 = smov [#allocation5]  }
  0x13   :  { %v23_v2 = vadd.f32 %v22_v1, %v21_v0  ;;  %s61_s18 = sshll.u32 %s127_s0, 4  ;;  %s62_s18 = int_to_ptr.vmem [resolvable:$true] %s61_s18 }
  0x14   :  { %s100_s19 = scalar_lea.vmem %s62_s18, 256  ;;  %p105_p9 = scmp.lt.s32.totalorder %s62_s18, %s62_s18 }
  0x15   :  { %24 = vadd.xlane.f32.xlu0 %v23_v2  ;;  %p101_p8 = scmp.ne.s32.totalorder %s62_s18, %s100_s19  ;;  %p106_p10 = scmp.lt.s32.totalorder %s100_s19, %s100_s19 }
  0x17   :  { %p107_p11 = por %p106_p10, %p105_p9 }
  0x19   :  { %p108_p12 = pnand %p107_p11, %p101_p8 }
  0xa2   :  { %v25_v3 = vpop.xlane.xlu0 %24 }
  0xa3   :  { %v26_v4 = vmul.f32 0.00390625, %v25_v3 }
  0xa5   :  { %v27_v5 = vsub.f32 %v21_v0, %v26_v4  ;;  %v28_v6 = vsub.f32 %v22_v1, %v26_v4 }
  0xa7   :  { %v29_v7 = vmul.f32 %v27_v5, %v27_v5  ;;  %v30_v8 = vmul.f32 %v28_v6, %v28_v6 }
  0xa9   :  { %v31_v9 = vadd.f32 %v30_v8, %v29_v7 }
  0xab   :  { %32 = vadd.xlane.f32.xlu0 %v31_v9 }
 0x138   :  { %v33_v10 = vpop.xlane.xlu0 %32 }
 0x139   :  { %v34_v11 = vmul.f32 0.003921569, %v33_v10 }
 0x13b   :  { %v35_v12 = vadd.f32 0.0001, %v34_v11 }
 0x13d   :  { %v36_v13 = vmul.f32 4.0, %v35_v12 }
 0x13f   :  { %72 = vrcp.f32 %v36_v13 }
 0x149   :  { %v73_v14 = vpop.eup %72 }
 0x14a   :  { %v39_v15 = vmul.f32 %v73_v14, %v29_v7  ;;  %v40_v16 = vmul.f32 %v73_v14, %v30_v8 }
 0x14c   :  { %v41_v17 = vadd.f32 0.5, %v39_v15  ;;  %v42_v18 = vadd.f32 0.5, %v40_v16 }
 0x14e   :  { %v43_v19 = vmul.f32 0.5, %v41_v17  ;;  %v44_v20 = vmul.f32 0.5, %v42_v18 }
 0x150   :  { %74 = vtanh.f32 %v43_v19 }
 0x151   :  { %76 = vtanh.f32 %v44_v20 }
 0x15a   :  { %v75_v21 = vpop.eup %74 }
 0x15b   :  { %v77_v22 = vpop.eup %76  ;;  %v47_v23 = vmul.f32 0.5, %v75_v21 }
 0x15c   :  { %v48_v24 = vmul.f32 0.5, %v77_v22 }
 0x15d   :  { %v49_v25 = vadd.f32 0.5, %v47_v23 }
 0x15e   :  { %v50_v26 = vadd.f32 0.5, %v48_v24 }
 0x15f   :  { %v51_v27 = vmul.f32 %v49_v25, %v21_v0 }
 0x160   :  { %v52_v28 = vmul.f32 %v50_v26, %v22_v1 }
 0x161   :  { %53 = vst [vmem:[#allocation5] sm:$0xff] %v51_v27 }
 0x162   :  { %54 = vst [vmem:[#allocation5 + $0x8] sm:$0xff] %v52_v28 }
 0x163   :  { %111 = shalt.err (!%p108_p12)
}
 0x164   :  { %s112_s22 = scalar_lea.hbm %s163_s1, 256 }
 0x165   :  { %p113_p13 = scmp.ne.s32.totalorder %s163_s1, %s112_s22  ;;  %p116_p0 = scmp.lt.u32.totalorder %s112_s22, %s163_s1 }
 0x167   :  { %p118_p1 = pnand %p116_p0, %p113_p13 }
 0x169   :  { %121 = shalt.err (!%p118_p1)
}
 0x16a   :  { %64 = dma.vmem_to_hbm [thread:$0]  %s62_s18, 256, %s163_s1, [#allocation4]  }
 0x16b   :  { %124 = dma.done.wait [#allocation4], 256  }
 0x16c   :  { %125 = vsyncadd [#allocation4], 4294967040 }
 0x16d   :  { %68 = vsyncpa [#allocation3], 1 }
 0x16e   :  { %69 = vsyncpa [#allocation4], 1 }

</bundles_post_ra>
